<compile_context>
chip_gen: v7x
topology: tpu7x:2x2x1
jax: 0.10.0
libtpu: 0.0.40
codegen_flags: <defaults>
</compile_context>

<pallas_src>
import jax
import jax.numpy as jnp
from jax.experimental import pallas as pl
from jax.experimental.pallas import tpu as pltpu

# Small, fixed problem sizes (consistent with the module's forward contract).
N, CIN, H, W = 2, 3, 16, 16        # batch, in_chans=3, spatial
CFEAT = 32                         # synthetic backbone feature width
NUM_CLASSES = 7                    # num_classes=7
KH = KW = 3                        # conv kernel
NHW = N * H * W                    # 512 spatial positions across the batch
KK = KH * KW * CIN                 # 27 im2col columns (+1 bias column below)

KPAD = 128                         # lane-padded im2col width  (27+1 -> 128)
FPAD = 128                         # lane-padded feature width (32+1 -> 128)
NCPAD = 128                        # lane-padded class width   (7    -> 128)


def fd_kernel(patches_ref, w1_ref, poolT_ref, w2_ref, out_ref):
    """conv(im2col matmul) + ReLU + avg-pool(matmul) + linear head (matmul).

    patches_ref: (NHW, KPAD)   im2col patches; col KK is the constant-1 bias col
    w1_ref     : (KPAD, FPAD)  conv weight; row KK = conv bias, (KK, CFEAT)=1
    poolT_ref  : (N, NHW)      per-image average-pool matrix (1/(H*W) mask)
    w2_ref     : (FPAD, NCPAD) classifier weight; row CFEAT = classifier bias
    out_ref    : (N, NCPAD)    padded logits (full unmasked lane-dense store)
    """
    # 'same' 3x3 conv + bias for the whole batch as ONE MXU matmul, then ReLU.
    acc = jnp.maximum(
        jnp.dot(patches_ref[...], w1_ref[...],
                preferred_element_type=jnp.float32), 0.0)       # (NHW, FPAD)

    # Global average pool per image as a matmul; feature column CFEAT pools
    # to exactly 1.0 and carries the classifier bias through the next matmul.
    pooled = jnp.dot(poolT_ref[...], acc,
                     preferred_element_type=jnp.float32)        # (N, FPAD)

    # Classifier head (bias already folded into row CFEAT of w2).
    out_ref[...] = jnp.dot(pooled, w2_ref[...],
                           preferred_element_type=jnp.float32)  # (N, NCPAD)


@jax.jit
def fd_model(x_nchw, w1, b1, w2, b2):
    # --- im2col patch matrix (built once in the jitted wrapper; subsumes the
    #     NCHW->NHWC transpose and the explicit 'same' padding) ------------
    x = jnp.transpose(x_nchw, (0, 2, 3, 1)).astype(jnp.float32)   # (N,H,W,CIN)
    xp = jnp.pad(x, ((0, 0), (1, 1), (1, 1), (0, 0)))             # (N,H+2,W+2,CIN)
    cols = [xp[:, kh:kh + H, kw:kw + W, :]
            for kh in range(KH) for kw in range(KW)]              # 9 x (N,H,W,CIN)
    patches = jnp.concatenate(cols, axis=-1).reshape(NHW, KK)     # (512, 27)
    # Append the constant-1 bias column, then lane-pad 28 -> 128.
    patches_p = jnp.pad(
        jnp.concatenate([patches, jnp.ones((NHW, 1), jnp.float32)], axis=1),
        ((0, 0), (0, KPAD - KK - 1)))                             # (512, 128)

    # --- conv weight: flatten, fold bias into row KK, pad to (128, 128) ---
    w1_flat = w1.reshape(KK, CFEAT)                               # (27, 32)
    w1_p = jnp.zeros((KPAD, FPAD), jnp.float32)
    w1_p = w1_p.at[:KK, :CFEAT].set(w1_flat)
    w1_p = w1_p.at[KK, :CFEAT].set(b1[0])          # conv bias via 1-column
    w1_p = w1_p.at[KK, CFEAT].set(1.0)             # constant-1 feature channel

    # --- classifier weight: fold bias into row CFEAT, pad to (128, 128) ---
    w2_p = jnp.zeros((FPAD, NCPAD), jnp.float32)
    w2_p = w2_p.at[:CFEAT, :NUM_CLASSES].set(w2)
    w2_p = w2_p.at[CFEAT, :NUM_CLASSES].set(b2[0])  # head bias via 1-feature

    # --- constant per-image average-pool matrix (compile-time folded) -----
    img = jnp.arange(NHW, dtype=jnp.int32) // (H * W)
    poolT = (img[None, :] == jnp.arange(N, dtype=jnp.int32)[:, None]
             ).astype(jnp.float32) / float(H * W)                 # (2, 512)

    out = pl.pallas_call(
        fd_kernel,
        out_shape=jax.ShapeDtypeStruct((N, NCPAD), jnp.float32),
        grid=(1,),   # single step: whole batch, weights DMA'd exactly once
        in_specs=[
            pl.BlockSpec((NHW, KPAD), lambda i: (0, 0)),
            pl.BlockSpec((KPAD, FPAD), lambda i: (0, 0)),
            pl.BlockSpec((N, NHW), lambda i: (0, 0)),
            pl.BlockSpec((FPAD, NCPAD), lambda i: (0, 0)),
        ],
        out_specs=pl.BlockSpec((N, NCPAD), lambda i: (0, 0)),
        compiler_params=pltpu.CompilerParams(
            dimension_semantics=("arbitrary",)),
    )(patches_p, w1_p, poolT, w2_p)

    return out[:, :NUM_CLASSES]  # (N, 7)


def fd_model_reference(x_nchw, w1, b1, w2, b2):
    """Pure-JAX reference of the same synthetic forward pass."""
    x = jnp.transpose(x_nchw, (0, 2, 3, 1)).astype(jnp.float32)
    y = jax.lax.conv_general_dilated(
        x, w1, window_strides=(1, 1), padding="SAME",
        dimension_numbers=("NHWC", "HWIO", "NHWC"))
    y = jnp.maximum(y + b1[0], 0.0)
    pooled = jnp.mean(y, axis=(1, 2))
    return pooled @ w2 + b2[0]


def init_params():
    # Deterministic synthetic weights (no checkpoint loading).
    k1, k2, k3, k4 = jax.random.split(jax.random.PRNGKey(42), 4)
    w1 = jax.random.normal(k1, (KH, KW, CIN, CFEAT), jnp.float32) * 0.1
    b1 = jax.random.normal(k2, (1, CFEAT), jnp.float32) * 0.1
    w2 = jax.random.normal(k3, (CFEAT, NUM_CLASSES), jnp.float32) * 0.1
    b2 = jax.random.normal(k4, (1, NUM_CLASSES), jnp.float32) * 0.1
    return w1, b1, w2, b2


if __name__ == "__main__":
    x = jax.random.normal(jax.random.PRNGKey(0), (N, CIN, H, W), jnp.float32)
    w1, b1, w2, b2 = init_params()

    out = fd_model(x, w1, b1, w2, b2)
    out = jax.block_until_ready(out)

    ref = fd_model_reference(x, w1, b1, w2, b2)
    assert out.shape == (N, NUM_CLASSES)
    assert jnp.allclose(out, ref, atol=1e-3, rtol=1e-3), "mismatch vs JAX reference"

    print("KERNEL_OK")
</pallas_src>

<mosaic_0001>
module attributes {stable_mosaic.version = 11 : i64} {
  func.func @fd_kernel(%arg0: i32, %arg1: memref<512x128xf32, #tpu.memory_space<vmem>>, %arg2: memref<128x128xf32, #tpu.memory_space<vmem>>, %arg3: memref<2x512xf32, #tpu.memory_space<vmem>>, %arg4: memref<128x128xf32, #tpu.memory_space<vmem>>, %arg5: memref<2x128xf32, #tpu.memory_space<vmem>>) attributes {dimension_semantics = [#tpu.dimension_semantics<arbitrary>], iteration_bounds = array<i64: 1>, scalar_prefetch = 0 : i64, scratch_operands = 0 : i64, tpu.core_type = #tpu.core_type<tc>, window_params = [{pipeline_mode = #tpu.pipeline_mode<synchronous>, transform_indices = @transform_0, window_bounds = array<i64: 512, 128>}, {pipeline_mode = #tpu.pipeline_mode<synchronous>, transform_indices = @transform_1, window_bounds = array<i64: 128, 128>}, {pipeline_mode = #tpu.pipeline_mode<synchronous>, transform_indices = @transform_2, window_bounds = array<i64: 2, 512>}, {pipeline_mode = #tpu.pipeline_mode<synchronous>, transform_indices = @transform_3, window_bounds = array<i64: 128, 128>}, {pipeline_mode = #tpu.pipeline_mode<synchronous>, transform_indices = @transform_4, window_bounds = array<i64: 2, 128>}]} {
    %c0 = arith.constant 0 : index
    %c0_0 = arith.constant 0 : index
    %0 = vector.load %arg1[%c0, %c0_0] : memref<512x128xf32, #tpu.memory_space<vmem>>, vector<512x128xf32>
    %c0_1 = arith.constant 0 : index
    %c0_2 = arith.constant 0 : index
    %1 = vector.load %arg2[%c0_1, %c0_2] : memref<128x128xf32, #tpu.memory_space<vmem>>, vector<128x128xf32>
    %cst = arith.constant dense<0.000000e+00> : vector<512x128xf32>
    %2 = tpu.matmul %0, %1, %cst {dimension_numbers = #tpu.dot_dimension_numbers<[1], [0], [0], [1], [0, 0, 1, 1], [], []>} : vector<512x128xf32>, vector<128x128xf32>, vector<512x128xf32> -> vector<512x128xf32>
    %cst_3 = arith.constant 0.000000e+00 : f32
    %3 = vector.broadcast %cst_3 : f32 to vector<512x128xf32>
    %4 = arith.maximumf %2, %3 : vector<512x128xf32>
    %c0_4 = arith.constant 0 : index
    %c0_5 = arith.constant 0 : index
    %5 = vector.load %arg3[%c0_4, %c0_5] : memref<2x512xf32, #tpu.memory_space<vmem>>, vector<2x512xf32>
    %cst_6 = arith.constant dense<0.000000e+00> : vector<2x128xf32>
    %6 = tpu.matmul %5, %4, %cst_6 {dimension_numbers = #tpu.dot_dimension_numbers<[1], [0], [0], [1], [0, 0, 1, 1], [], []>} : vector<2x512xf32>, vector<512x128xf32>, vector<2x128xf32> -> vector<2x128xf32>
    %c0_7 = arith.constant 0 : index
    %c0_8 = arith.constant 0 : index
    %7 = vector.load %arg4[%c0_7, %c0_8] : memref<128x128xf32, #tpu.memory_space<vmem>>, vector<128x128xf32>
    %cst_9 = arith.constant dense<0.000000e+00> : vector<2x128xf32>
    %8 = tpu.matmul %6, %7, %cst_9 {dimension_numbers = #tpu.dot_dimension_numbers<[1], [0], [0], [1], [0, 0, 1, 1], [], []>} : vector<2x128xf32>, vector<128x128xf32>, vector<2x128xf32> -> vector<2x128xf32>
    %c0_10 = arith.constant 0 : index
    %c0_11 = arith.constant 0 : index
    %9 = vector.load %arg5[%c0_10, %c0_11] : memref<2x128xf32, #tpu.memory_space<vmem>>, vector<2x128xf32>
    tpu.vector_store %arg5[%c0_10, %c0_11], %8 {strides = array<i32>} : memref<2x128xf32, #tpu.memory_space<vmem>>, vector<2x128xf32>,
    return
  }
  func.func @transform_0(%arg0: i32) -> (i32, i32) {
    %c0_i32 = arith.constant 0 : i32
    %c0_i32_0 = arith.constant 0 : i32
    %c0_i32_1 = arith.constant 0 : i32
    return %c0_i32, %c0_i32_0 : i32, i32
  }
  func.func @transform_1(%arg0: i32) -> (i32, i32) {
    %c0_i32 = arith.constant 0 : i32
    %c0_i32_0 = arith.constant 0 : i32
    %c0_i32_1 = arith.constant 0 : i32
    return %c0_i32, %c0_i32_0 : i32, i32
  }
  func.func @transform_2(%arg0: i32) -> (i32, i32) {
    %c0_i32 = arith.constant 0 : i32
    %c0_i32_0 = arith.constant 0 : i32
    %c0_i32_1 = arith.constant 0 : i32
    return %c0_i32, %c0_i32_0 : i32, i32
  }
  func.func @transform_3(%arg0: i32) -> (i32, i32) {
    %c0_i32 = arith.constant 0 : i32
    %c0_i32_0 = arith.constant 0 : i32
    %c0_i32_1 = arith.constant 0 : i32
    return %c0_i32, %c0_i32_0 : i32, i32
  }
  func.func @transform_4(%arg0: i32) -> (i32, i32) {
    %c0_i32 = arith.constant 0 : i32
    %c0_i32_0 = arith.constant 0 : i32
    %c0_i32_1 = arith.constant 0 : i32
    return %c0_i32, %c0_i32_0 : i32, i32
  }
}

</mosaic_0001>

<bundles_post_ra>
// kernel: fd_model.1
= control target key start
LH: loop header
LB: loop body
LE: loop exit
PB: predicated region body
PF: predicated region fallthrough
CT: control target
= control target key end

     0   :  { %s1634_s0 = inlined_call_operand.vmem [shape: f32[512,128], index: 0, kind: input, shape index: {}]   ;;  %s1635_s1 = inlined_call_operand.vmem [shape: f32[128,128], index: 1, kind: input, shape index: {}]   ;;  %s1636_s2 = inlined_call_operand.vmem [shape: f32[2,512], index: 2, kind: input, shape index: {}]   ;;  %s1637_s3 = inlined_call_operand.vmem [shape: f32[128,128], index: 3, kind: input, shape index: {}]   ;;  %s1638_s4 = inlined_call_operand.hbm [shape: f32[2,128], index: 4, kind: output, shape index: {}]  }
   0x1   :  { %v82_v0 = vld [vmem:[%s1635_s1] sm:$0xff]  ;;  %v83_v1 = vld [vmem:[%s1635_s1 + $0x8] sm:$0xff]  ;;  %v84_v2 = vld [vmem:[%s1635_s1 + $0x10] sm:$0xff] }
   0x2   :  { %v1141_v3 = vpack.c.bf16 %v83_v1, %v82_v0  ;;  %v85_v4 = vld [vmem:[%s1635_s1 + $0x18] sm:$0xff]  ;;  %v86_v6 = vld [vmem:[%s1635_s1 + $0x20] sm:$0xff]  ;;  %v87_v7 = vld [vmem:[%s1635_s1 + $0x28] sm:$0xff] }
   0x3   :  { %v1145_v5 = vpack.c.bf16 %v85_v4, %v84_v2  ;;  %v1149_v8 = vpack.c.bf16 %v87_v7, %v86_v6  ;;  %v18_v9 = vld [vmem:[%s1634_s0] sm:$0xff]  ;;  %v88_v10 = vld [vmem:[%s1635_s1 + $0x30] sm:$0xff]  ;;  %v89_v11 = vld [vmem:[%s1635_s1 + $0x38] sm:$0xff] }
   0x4   :  { %1142 = vmatprep.subr.bf16.mxu0 %v1141_v3  ;;  %1010 = vmatprep.mubr.f32.mxu0 %v18_v9  ;;  %v1153_v12 = vpack.c.bf16 %v89_v11, %v88_v10  ;;  %v90_v13 = vld [vmem:[%s1635_s1 + $0x40] sm:$0xff]  ;;  %v91_v14 = vld [vmem:[%s1635_s1 + $0x48] sm:$0xff]  ;;  %v92_v16 = vld [vmem:[%s1635_s1 + $0x50] sm:$0xff] }
   0x5   :  { %1144 = vmatpush3.bf16.msra.mxu0 %v1141_v3  ;;  %v1157_v15 = vpack.c.bf16 %v91_v14, %v90_v13  ;;  %v93_v17 = vld [vmem:[%s1635_s1 + $0x58] sm:$0xff]  ;;  %v94_v19 = vld [vmem:[%s1635_s1 + $0x60] sm:$0xff]  ;;  %v95_v20 = vld [vmem:[%s1635_s1 + $0x68] sm:$0xff] }
   0x6   :  { %1146 = vmatprep.subr.bf16.mxu0 %v1145_v5  ;;  %v1161_v18 = vpack.c.bf16 %v93_v17, %v92_v16  ;;  %v1165_v21 = vpack.c.bf16 %v95_v20, %v94_v19  ;;  %v96_v22 = vld [vmem:[%s1635_s1 + $0x70] sm:$0xff]  ;;  %v97_v23 = vld [vmem:[%s1635_s1 + $0x78] sm:$0xff] }
   0x7   :  { %v1169_v24 = vpack.c.bf16 %v97_v23, %v96_v22 }
   0x9   :  { %1148 = vmatpush3.bf16.msra.mxu0 %v1145_v5 }
   0xa   :  { %1150 = vmatprep.subr.bf16.mxu0 %v1149_v8 }
   0xd   :  { %1152 = vmatpush3.bf16.msra.mxu0 %v1149_v8 }
   0xe   :  { %1154 = vmatprep.subr.bf16.mxu0 %v1153_v12 }
  0x11   :  { %1156 = vmatpush3.bf16.msra.mxu0 %v1153_v12 }
  0x12   :  { %1158 = vmatprep.subr.bf16.mxu0 %v1157_v15 }
  0x15   :  { %1160 = vmatpush3.bf16.msra.mxu0 %v1157_v15 }
  0x16   :  { %1162 = vmatprep.subr.bf16.mxu0 %v1161_v18 }
  0x19   :  { %1164 = vmatpush3.bf16.msra.mxu0 %v1161_v18 }
  0x1a   :  { %1166 = vmatprep.subr.bf16.mxu0 %v1165_v21 }
  0x1b   :  { %9 = vsyncpa [#allocation3], 0  ;;  %v19_v25 = vld [vmem:[%s1634_s0 + $0x8] sm:$0xff]  ;;  %v20_v26 = vld [vmem:[%s1634_s0 + $0x10] sm:$0xff]  ;;  %vm1293_vm0 = vmmov 0   ;;  %s1295_s17 = smov [#allocation2]  }
  0x1c   :  { %v21_v27 = vld [vmem:[%s1634_s0 + $0x18] sm:$0xff]  ;;  %v22_v28 = vld [vmem:[%s1634_s0 + $0x20] sm:$0xff]  ;;  %v23_v29 = vld [vmem:[%s1634_s0 + $0x28] sm:$0xff]  ;;  %s803_s18 = sshll.u32 %s1295_s17, 4  ;;  %s804_s18 = int_to_ptr.vmem [resolvable:$true] %s803_s18 }
  0x1d   :  { %1168 = vmatpush3.bf16.msra.mxu0 %v1165_v21  ;;  %v24_v30 = vld [vmem:[%s1634_s0 + $0x30] sm:$0xff]  ;;  %v25_v31 = vld [vmem:[%s1634_s0 + $0x38] sm:$0xff]  ;;  %v26_v32 = vld [vmem:[%s1634_s0 + $0x40] sm:$0xff]  ;;  %p1272_p1 = scmp.lt.s32.totalorder %s804_s18, %s804_s18 }
  0x1e   :  { %1170 = vmatprep.subr.bf16.mxu0 %v1169_v24  ;;  %v27_v33 = vld [vmem:[%s1634_s0 + $0x48] sm:$0xff]  ;;  %v28_v34 = vld [vmem:[%s1634_s0 + $0x50] sm:$0xff]  ;;  %v29_v35 = vld [vmem:[%s1634_s0 + $0x58] sm:$0xff] }
  0x1f   :  { %v30_v36 = vld [vmem:[%s1634_s0 + $0x60] sm:$0xff]  ;;  %v31_v37 = vld [vmem:[%s1634_s0 + $0x68] sm:$0xff]  ;;  %v32_v38 = vld [vmem:[%s1634_s0 + $0x70] sm:$0xff] }
  0x20   :  { %v33_v39 = vld [vmem:[%s1634_s0 + $0x78] sm:$0xff]  ;;  %v34_v40 = vld [vmem:[%s1634_s0 + $0x80] sm:$0xff]  ;;  %v35_v41 = vld [vmem:[%s1634_s0 + $0x88] sm:$0xff] }
  0x21   :  { %1172 = vmatpush3.bf16.msra.mxu0 %v1169_v24  ;;  %v36_v42 = vld [vmem:[%s1634_s0 + $0x90] sm:$0xff]  ;;  %v37_v43 = vld [vmem:[%s1634_s0 + $0x98] sm:$0xff]  ;;  %v38_v44 = vld [vmem:[%s1634_s0 + $0xa0] sm:$0xff]  ;;  %v1291_v24 = vmov 1983009808  }
  0x22   :  { %v39_v45 = vld [vmem:[%s1634_s0 + $0xa8] sm:$0xff]  ;;  %v40_v46 = vld [vmem:[%s1634_s0 + $0xb0] sm:$0xff]  ;;  %v41_v47 = vld [vmem:[%s1634_s0 + $0xb8] sm:$0xff] }
  0x23   :  { %v42_v48 = vld [vmem:[%s1634_s0 + $0xc0] sm:$0xff]  ;;  %v43_v49 = vld [vmem:[%s1634_s0 + $0xc8] sm:$0xff]  ;;  %v44_v50 = vld [vmem:[%s1634_s0 + $0xd0] sm:$0xff] }
  0x24   :  { %1011 = vmatmul.mubr.f32.vlgmr.msra.gmra.mrb[0].mxu0 %v19_v25  ;;  %v45_v51 = vld [vmem:[%s1634_s0 + $0xd8] sm:$0xff]  ;;  %v46_v52 = vld [vmem:[%s1634_s0 + $0xe0] sm:$0xff]  ;;  %v47_v53 = vld [vmem:[%s1634_s0 + $0xe8] sm:$0xff]  ;;  %v551_v25 = vunpack.c.l.s4 %v1291_v24 }
  0x25   :  { %1013 = vmatprep.mubr.f32.mxu0 %v20_v26  ;;  %v48_v54 = vld [vmem:[%s1634_s0 + $0xf0] sm:$0xff]  ;;  %v49_v55 = vld [vmem:[%s1634_s0 + $0xf8] sm:$0xff]  ;;  %v50_v56 = vld [vmem:[%s1634_s0 + $0x100] sm:$0xff]  ;;  %v553_v26 = vlaneseq }
  0x26   :  { %v51_v57 = vld [vmem:[%s1634_s0 + $0x108] sm:$0xff]  ;;  %v52_v58 = vld [vmem:[%s1634_s0 + $0x110] sm:$0xff]  ;;  %v53_v59 = vld [vmem:[%s1634_s0 + $0x118] sm:$0xff] }
  0x27   :  { %v54_v60 = vld [vmem:[%s1634_s0 + $0x120] sm:$0xff]  ;;  %v55_v61 = vld [vmem:[%s1634_s0 + $0x128] sm:$0xff]  ;;  %v56_v62 = vld [vmem:[%s1634_s0 + $0x130] sm:$0xff] }
  0x28   :  { %1014 = vmatmul.mubr.f32.gmra.mrb[2].mxu0 %v21_v27  ;;  %v57_v63 = vld [vmem:[%s1634_s0 + $0x138] sm:$0xff]  ;;  %v58_v0 = vld [vmem:[%s1634_s0 + $0x140] sm:$0xff]  ;;  %v59_v1 = vld [vmem:[%s1634_s0 + $0x148] sm:$0xff]  ;;  %v552_v27 = vunpack.c.0.s8 %v551_v25 }
  0x29   :  { %1016 = vmatprep.mubr.f32.mxu0 %v22_v28  ;;  %v60_v2 = vld [vmem:[%s1634_s0 + $0x150] sm:$0xff]  ;;  %v61_v3 = vld [vmem:[%s1634_s0 + $0x158] sm:$0xff]  ;;  %v62_v4 = vld [vmem:[%s1634_s0 + $0x160] sm:$0xff]  ;;  %v554_v28 = vshrl.u32 %v553_v26, 7 }
  0x2a   :  { %v63_v5 = vld [vmem:[%s1634_s0 + $0x168] sm:$0xff]  ;;  %v64_v6 = vld [vmem:[%s1634_s0 + $0x170] sm:$0xff]  ;;  %v65_v7 = vld [vmem:[%s1634_s0 + $0x178] sm:$0xff] }
  0x2b   :  { %v66_v8 = vld [vmem:[%s1634_s0 + $0x180] sm:$0xff]  ;;  %v67_v9 = vld [vmem:[%s1634_s0 + $0x188] sm:$0xff]  ;;  %v68_v10 = vld [vmem:[%s1634_s0 + $0x190] sm:$0xff] }
  0x2c   :  { %1017 = vmatmul.mubr.f32.gmra.mrb[4].mxu0 %v23_v29  ;;  %v69_v11 = vld [vmem:[%s1634_s0 + $0x198] sm:$0xff]  ;;  %v70_v12 = vld [vmem:[%s1634_s0 + $0x1a0] sm:$0xff]  ;;  %v71_v13 = vld [vmem:[%s1634_s0 + $0x1a8] sm:$0xff]  ;;  %v555_v29 = vsub.s32 %v552_v27, %v554_v28 }
  0x2d   :  { %1019 = vmatprep.mubr.f32.mxu0 %v24_v30  ;;  %v72_v14 = vld [vmem:[%s1634_s0 + $0x1b0] sm:$0xff]  ;;  %v73_v15 = vld [vmem:[%s1634_s0 + $0x1b8] sm:$0xff]  ;;  %v74_v16 = vld [vmem:[%s1634_s0 + $0x1c0] sm:$0xff] }
  0x2e   :  { %v75_v17 = vld [vmem:[%s1634_s0 + $0x1c8] sm:$0xff]  ;;  %v76_v18 = vld [vmem:[%s1634_s0 + $0x1d0] sm:$0xff]  ;;  %v77_v19 = vld [vmem:[%s1634_s0 + $0x1d8] sm:$0xff] }
  0x2f   :  { %v78_v20 = vld [vmem:[%s1634_s0 + $0x1e0] sm:$0xff]  ;;  %v79_v21 = vld [vmem:[%s1634_s0 + $0x1e8] sm:$0xff]  ;;  %v80_v22 = vld [vmem:[%s1634_s0 + $0x1f0] sm:$0xff] }
  0x30   :  { %1020 = vmatmul.mubr.f32.gmra.mrb[6].mxu0 %v25_v31  ;;  %v81_v23 = vld [vmem:[%s1634_s0 + $0x1f8] sm:$0xff]  ;;  %v547_v30 = vld [vmem:[%s1636_s2] sm:$0xff] }
  0x31   :  { %1022 = vmatprep.mubr.f32.mxu0 %v26_v32  ;;  %v1564_v31 = vrot.slane %v547_v30, %v555_v29 }
  0x33   :  { %v564_v32 = vcombine.high %v1564_v31, %v1564_v31 }
  0x34   :  { %1023 = vmatmul.mubr.f32.gmra.mrb[8].mxu0 %v27_v33  ;;  %v549_v33 = vcombine.high %v547_v30, %v547_v30 }
  0x35   :  { %1025 = vmatprep.mubr.f32.mxu0 %v28_v34  ;;  %634 = vmatprep.mubr.f32.mxu1 %v564_v32 }
  0x38   :  { %1026 = vmatmul.mubr.f32.gmra.mrb[10].mxu0 %v29_v35 }
  0x39   :  { %1028 = vmatprep.mubr.f32.mxu0 %v30_v36 }
  0x3c   :  { %1029 = vmatmul.mubr.f32.gmra.mrb[12].mxu0 %v31_v37  ;;  %v1568_v37 = vrot.slane %v549_v33, %v555_v29 }
  0x3d   :  { %1031 = vmatprep.mubr.f32.mxu0 %v32_v38 }
  0x40   :  { %1032 = vmatmul.mubr.f32.gmra.mrb[14].mxu0 %v33_v39 }
  0x41   :  { %1034 = vmatprep.mubr.f32.mxu0 %v34_v40 }
  0x44   :  { %1035 = vmatmul.mubr.f32.gmra.mrb[16].mxu0 %v35_v41 }
  0x45   :  { %1037 = vmatprep.mubr.f32.mxu0 %v36_v42 }
  0x48   :  { %1038 = vmatmul.mubr.f32.gmra.mrb[18].mxu0 %v37_v43 }
  0x49   :  { %1040 = vmatprep.mubr.f32.mxu0 %v38_v44 }
  0x4c   :  { %1041 = vmatmul.mubr.f32.gmra.mrb[20].mxu0 %v39_v45 }
  0x4d   :  { %1043 = vmatprep.mubr.f32.mxu0 %v40_v46 }
  0x50   :  { %1044 = vmatmul.mubr.f32.gmra.mrb[22].mxu0 %v41_v47 }
  0x51   :  { %1046 = vmatprep.mubr.f32.mxu0 %v42_v48 }
  0x54   :  { %1047 = vmatmul.mubr.f32.gmra.mrb[24].mxu0 %v43_v49 }
  0x55   :  { %1049 = vmatprep.mubr.f32.mxu0 %v44_v50 }
  0x58   :  { %1050 = vmatmul.mubr.f32.gmra.mrb[26].mxu0 %v45_v51 }
  0x59   :  { %1052 = vmatprep.mubr.f32.mxu0 %v46_v52 }
  0x5c   :  { %1053 = vmatmul.mubr.f32.gmra.mrb[28].mxu0 %v47_v53 }
  0x5d   :  { %1055 = vmatprep.mubr.f32.mxu0 %v48_v54 }
  0x60   :  { %1056 = vmatmul.mubr.f32.gmra.mrb[30].mxu0 %v49_v55 }
  0x61   :  { %1058 = vmatprep.mubr.f32.mxu0 %v50_v56 }
  0x64   :  { %1059 = vmatmul.mubr.f32.gmra.mrb[32].mxu0 %v51_v57 }
  0x65   :  { %1061 = vmatprep.mubr.f32.mxu0 %v52_v58 }
  0x68   :  { %1062 = vmatmul.mubr.f32.gmra.mrb[34].mxu0 %v53_v59 }
  0x69   :  { %1064 = vmatprep.mubr.f32.mxu0 %v54_v60 }
  0x6c   :  { %1065 = vmatmul.mubr.f32.gmra.mrb[36].mxu0 %v55_v61 }
  0x6d   :  { %1067 = vmatprep.mubr.f32.mxu0 %v56_v62 }
  0x70   :  { %1068 = vmatmul.mubr.f32.gmra.mrb[38].mxu0 %v57_v63 }
  0x71   :  { %1070 = vmatprep.mubr.f32.mxu0 %v58_v0 }
  0x74   :  { %1071 = vmatmul.mubr.f32.gmra.mrb[40].mxu0 %v59_v1 }
  0x75   :  { %1073 = vmatprep.mubr.f32.mxu0 %v60_v2 }
  0x78   :  { %1074 = vmatmul.mubr.f32.gmra.mrb[42].mxu0 %v61_v3 }
  0x79   :  { %1076 = vmatprep.mubr.f32.mxu0 %v62_v4 }
  0x7c   :  { %1077 = vmatmul.mubr.f32.gmra.mrb[44].mxu0 %v63_v5 }
  0x7d   :  { %1079 = vmatprep.mubr.f32.mxu0 %v64_v6 }
  0x80   :  { %1080 = vmatmul.mubr.f32.gmra.mrb[46].mxu0 %v65_v7 }
  0x81   :  { %1082 = vmatprep.mubr.f32.mxu0 %v66_v8 }
  0x84   :  { %1083 = vmatmul.mubr.f32.gmra.mrb[48].mxu0 %v67_v9 }
  0x85   :  { %1085 = vmatprep.mubr.f32.mxu0 %v68_v10 }
  0x88   :  { %1086 = vmatmul.mubr.f32.gmra.mrb[50].mxu0 %v69_v11 }
  0x89   :  { %1088 = vmatprep.mubr.f32.mxu0 %v70_v12 }
  0x8c   :  { %1089 = vmatmul.mubr.f32.gmra.mrb[52].mxu0 %v71_v13 }
  0x8d   :  { %1091 = vmatprep.mubr.f32.mxu0 %v72_v14 }
  0x90   :  { %1092 = vmatmul.mubr.f32.gmra.mrb[54].mxu0 %v73_v15 }
  0x91   :  { %1094 = vmatprep.mubr.f32.mxu0 %v74_v16 }
  0x94   :  { %1095 = vmatmul.mubr.f32.gmra.mrb[56].mxu0 %v75_v17 }
  0x95   :  { %1097 = vmatprep.mubr.f32.mxu0 %v76_v18 }
  0x98   :  { %1098 = vmatmul.mubr.f32.gmra.mrb[58].mxu0 %v77_v19 }
  0x99   :  { %1100 = vmatprep.mubr.f32.mxu0 %v78_v20 }
  0x9c   :  { %1101 = vmatmul.mubr.f32.gmra.mrb[60].mxu0 %v79_v21 }
  0x9d   :  { %1103 = vmatprep.mubr.f32.mxu0 %v80_v22 }
  0xa0   :  { %1104 = vmatmul.mubr.f32.gmra.mrb[62].mxu0 %v81_v23 }
  0xf7   :  { %v1012_v34 = vpop.f32.mrb[0].mxu0 }
  0xf8   :  { %v484_v35 = vmax.f32 %v1012_v34, 0.0  ;;  %v164_v36 = vpop.f32.mrb[1].mxu0 }
  0xf9   :  { %v483_v38 = vmax.f32 %v164_v36, 0.0 }
  0xfb   :  { %v1015_v39 = vpop.f32.mrb[2].mxu0  ;;  %v1175_v40 = vpack.c.bf16 %v484_v35, %v483_v38 }
  0xfc   :  { %v486_v41 = vmax.f32 %v1015_v39, 0.0  ;;  %v174_v42 = vpop.f32.mrb[3].mxu0 }
  0xfd   :  { %v485_v43 = vmax.f32 %v174_v42, 0.0 }
  0xff   :  { %v1179_v44 = vpack.c.bf16 %v486_v41, %v485_v43  ;;  %v1018_v45 = vpop.f32.mrb[4].mxu0 }
 0x100   :  { %v488_v46 = vmax.f32 %v1018_v45, 0.0  ;;  %v184_v47 = vpop.f32.mrb[5].mxu0 }
 0x101   :  { %v487_v48 = vmax.f32 %v184_v47, 0.0 }
 0x103   :  { %v1183_v49 = vpack.c.bf16 %v488_v46, %v487_v48  ;;  %v1021_v50 = vpop.f32.mrb[6].mxu0 }
 0x104   :  { %v490_v51 = vmax.f32 %v1021_v50, 0.0  ;;  %v194_v52 = vpop.f32.mrb[7].mxu0 }
 0x105   :  { %v489_v53 = vmax.f32 %v194_v52, 0.0 }
 0x107   :  { %v1187_v54 = vpack.c.bf16 %v490_v51, %v489_v53  ;;  %v1024_v55 = vpop.f32.mrb[8].mxu0 }
 0x108   :  { %v492_v56 = vmax.f32 %v1024_v55, 0.0  ;;  %v204_v57 = vpop.f32.mrb[9].mxu0 }
 0x109   :  { %v491_v58 = vmax.f32 %v204_v57, 0.0  ;;  %v565_v57 = vcombine.high %v1568_v37, %v1568_v37 }
 0x10b   :  { %v1191_v59 = vpack.c.bf16 %v492_v56, %v491_v58  ;;  %v1027_v60 = vpop.f32.mrb[10].mxu0 }
 0x10c   :  { %v494_v61 = vmax.f32 %v1027_v60, 0.0  ;;  %v214_v62 = vpop.f32.mrb[11].mxu0 }
 0x10d   :  { %v493_v63 = vmax.f32 %v214_v62, 0.0 }
 0x10f   :  { %v1195_v0 = vpack.c.bf16 %v494_v61, %v493_v63  ;;  %v1030_v1 = vpop.f32.mrb[12].mxu0 }
 0x110   :  { %v496_v2 = vmax.f32 %v1030_v1, 0.0  ;;  %v224_v3 = vpop.f32.mrb[13].mxu0 }
 0x111   :  { %v495_v4 = vmax.f32 %v224_v3, 0.0 }
 0x113   :  { %v1199_v5 = vpack.c.bf16 %v496_v2, %v495_v4  ;;  %v1033_v6 = vpop.f32.mrb[14].mxu0 }
 0x114   :  { %v498_v7 = vmax.f32 %v1033_v6, 0.0  ;;  %v234_v8 = vpop.f32.mrb[15].mxu0 }
 0x115   :  { %v497_v9 = vmax.f32 %v234_v8, 0.0 }
 0x117   :  { %v1203_v10 = vpack.c.bf16 %v498_v7, %v497_v9  ;;  %v1036_v11 = vpop.f32.mrb[16].mxu0 }
 0x118   :  { %v500_v12 = vmax.f32 %v1036_v11, 0.0  ;;  %v244_v13 = vpop.f32.mrb[17].mxu0 }
 0x119   :  { %v499_v14 = vmax.f32 %v244_v13, 0.0 }
 0x11b   :  { %v1039_v15 = vpop.f32.mrb[18].mxu0  ;;  %v1173_v16 = vpack.c.bf16 %v500_v12, %v499_v14 }
 0x11c   :  { %v502_v17 = vmax.f32 %v1039_v15, 0.0  ;;  %v254_v18 = vpop.f32.mrb[19].mxu0 }
 0x11d   :  { %v501_v19 = vmax.f32 %v254_v18, 0.0  ;;  %1174 = vmatprep.subr.bf16.mxu1 %v1173_v16 }
 0x11e   :  { %1176 = vmatpush3.bf16.msra.mxu1 %v1175_v40 }
 0x11f   :  { %v1177_v20 = vpack.c.bf16 %v502_v17, %v501_v19  ;;  %v1042_v21 = vpop.f32.mrb[20].mxu0 }
 0x120   :  { %v504_v22 = vmax.f32 %v1042_v21, 0.0  ;;  %v264_v23 = vpop.f32.mrb[21].mxu0 }
 0x121   :  { %v503_v24 = vmax.f32 %v264_v23, 0.0  ;;  %1178 = vmatprep.subr.bf16.mxu1 %v1177_v20 }
 0x122   :  { %1180 = vmatpush3.bf16.msra.mxu1 %v1179_v44 }
 0x123   :  { %v1181_v25 = vpack.c.bf16 %v504_v22, %v503_v24  ;;  %v1045_v26 = vpop.f32.mrb[22].mxu0 }
 0x124   :  { %v506_v27 = vmax.f32 %v1045_v26, 0.0  ;;  %v274_v28 = vpop.f32.mrb[23].mxu0 }
 0x125   :  { %v505_v29 = vmax.f32 %v274_v28, 0.0  ;;  %1182 = vmatprep.subr.bf16.mxu1 %v1181_v25 }
 0x126   :  { %1184 = vmatpush3.bf16.msra.mxu1 %v1183_v49 }
 0x127   :  { %v1185_v30 = vpack.c.bf16 %v506_v27, %v505_v29  ;;  %v1048_v32 = vpop.f32.mrb[24].mxu0 }
 0x128   :  { %v508_v33 = vmax.f32 %v1048_v32, 0.0  ;;  %v284_v34 = vpop.f32.mrb[25].mxu0 }
 0x129   :  { %v507_v35 = vmax.f32 %v284_v34, 0.0  ;;  %1186 = vmatprep.subr.bf16.mxu1 %v1185_v30 }
 0x12a   :  { %1188 = vmatpush3.bf16.msra.mxu1 %v1187_v54 }
 0x12b   :  { %v1189_v36 = vpack.c.bf16 %v508_v33, %v507_v35  ;;  %v1051_v38 = vpop.f32.mrb[26].mxu0 }
 0x12c   :  { %v510_v39 = vmax.f32 %v1051_v38, 0.0  ;;  %v294_v40 = vpop.f32.mrb[27].mxu0 }
 0x12d   :  { %v509_v41 = vmax.f32 %v294_v40, 0.0  ;;  %1190 = vmatprep.subr.bf16.mxu1 %v1189_v36 }
 0x12e   :  { %1192 = vmatpush3.bf16.msra.mxu1 %v1191_v59 }
 0x12f   :  { %v1193_v42 = vpack.c.bf16 %v510_v39, %v509_v41  ;;  %v1054_v43 = vpop.f32.mrb[28].mxu0 }
 0x130   :  { %v512_v44 = vmax.f32 %v1054_v43, 0.0  ;;  %v304_v45 = vpop.f32.mrb[29].mxu0 }
 0x131   :  { %v511_v46 = vmax.f32 %v304_v45, 0.0  ;;  %1194 = vmatprep.subr.bf16.mxu1 %v1193_v42 }
 0x132   :  { %1196 = vmatpush3.bf16.msra.mxu1 %v1195_v0 }
 0x133   :  { %v1197_v47 = vpack.c.bf16 %v512_v44, %v511_v46  ;;  %v1057_v48 = vpop.f32.mrb[30].mxu0 }
 0x134   :  { %v514_v49 = vmax.f32 %v1057_v48, 0.0  ;;  %v314_v50 = vpop.f32.mrb[31].mxu0 }
 0x135   :  { %v513_v51 = vmax.f32 %v314_v50, 0.0  ;;  %1198 = vmatprep.subr.bf16.mxu1 %v1197_v47 }
 0x136   :  { %1200 = vmatpush3.bf16.msra.mxu1 %v1199_v5 }
 0x137   :  { %v1201_v52 = vpack.c.bf16 %v514_v49, %v513_v51  ;;  %v1060_v53 = vpop.f32.mrb[32].mxu0 }
 0x138   :  { %v516_v54 = vmax.f32 %v1060_v53, 0.0  ;;  %v324_v55 = vpop.f32.mrb[33].mxu0 }
 0x139   :  { %v515_v56 = vmax.f32 %v324_v55, 0.0  ;;  %1202 = vmatprep.subr.bf16.mxu1 %v1201_v52 }
 0x13a   :  { %1204 = vmatpush3.bf16.msra.mxu1 %v1203_v10 }
 0x13b   :  { %v1207_v58 = vpack.c.bf16 %v516_v54, %v515_v56  ;;  %v1063_v59 = vpop.f32.mrb[34].mxu0 }
 0x13c   :  { %v518_v60 = vmax.f32 %v1063_v59, 0.0  ;;  %v334_v61 = vpop.f32.mrb[35].mxu0 }
 0x13d   :  { %v517_v62 = vmax.f32 %v334_v61, 0.0  ;;  %635 = vmatmul.mubr.f32.vlgmr.msra.gmra.mrb[0].mxu1 %v1564_v31 }
 0x13e   :  { %704 = vmatprep.mubr.f32.mxu1 %v565_v57 }
 0x13f   :  { %v1211_v63 = vpack.c.bf16 %v518_v60, %v517_v62  ;;  %v1066_v0 = vpop.f32.mrb[36].mxu0 }
 0x140   :  { %v520_v1 = vmax.f32 %v1066_v0, 0.0  ;;  %v344_v2 = vpop.f32.mrb[37].mxu0 }
 0x141   :  { %v519_v3 = vmax.f32 %v344_v2, 0.0 }
 0x143   :  { %v1215_v4 = vpack.c.bf16 %v520_v1, %v519_v3  ;;  %v1069_v5 = vpop.f32.mrb[38].mxu0 }
 0x144   :  { %v522_v6 = vmax.f32 %v1069_v5, 0.0  ;;  %v354_v7 = vpop.f32.mrb[39].mxu0 }
 0x145   :  { %v521_v8 = vmax.f32 %v354_v7, 0.0  ;;  %v710_v7 = vld [vmem:[%s1637_s3] sm:$0xff] }
 0x147   :  { %v1219_v9 = vpack.c.bf16 %v522_v6, %v521_v8  ;;  %v1072_v10 = vpop.f32.mrb[40].mxu0  ;;  %v711_v8 = vld [vmem:[%s1637_s3 + $0x8] sm:$0xff] }
 0x148   :  { %v524_v11 = vmax.f32 %v1072_v10, 0.0  ;;  %v364_v12 = vpop.f32.mrb[41].mxu0  ;;  %v1292_v10 = vmov 0.0|0.0  }
 0x149   :  { %v523_v13 = vmax.f32 %v364_v12, 0.0  ;;  %v713_v12 = vld [vmem:[%s1637_s3 + $0x18] sm:$0xff] }
 0x14b   :  { %v1223_v14 = vpack.c.bf16 %v524_v11, %v523_v13  ;;  %v1075_v15 = vpop.f32.mrb[42].mxu0  ;;  %v1238_v11 = vpack.c.bf16 %v711_v8, %v710_v7  ;;  %v714_v13 = vld [vmem:[%s1637_s3 + $0x20] sm:$0xff] }
 0x14c   :  { %v526_v16 = vmax.f32 %v1075_v15, 0.0  ;;  %v374_v31 = vpop.f32.mrb[43].mxu0 }
 0x14d   :  { %v525_v17 = vmax.f32 %v374_v31, 0.0  ;;  %v717_v31 = vld [vmem:[%s1637_s3 + $0x38] sm:$0xff] }
 0x14f   :  { %v1227_v18 = vpack.c.bf16 %v526_v16, %v525_v17  ;;  %v1078_v19 = vpop.f32.mrb[44].mxu0  ;;  %v716_v16 = vld [vmem:[%s1637_s3 + $0x30] sm:$0xff] }
 0x150   :  { %v528_v20 = vmax.f32 %v1078_v19, 0.0  ;;  %v384_v21 = vpop.f32.mrb[45].mxu0  ;;  %v1247_v17 = vpack.c.bf16 %v717_v31, %v716_v16  ;;  %v719_v19 = vld [vmem:[%s1637_s3 + $0x48] sm:$0xff] }
 0x151   :  { %v527_v22 = vmax.f32 %v384_v21, 0.0  ;;  %v720_v21 = vld [vmem:[%s1637_s3 + $0x50] sm:$0xff] }
 0x153   :  { %v1231_v23 = vpack.c.bf16 %v528_v20, %v527_v22  ;;  %v1081_v24 = vpop.f32.mrb[46].mxu0  ;;  %v721_v22 = vld [vmem:[%s1637_s3 + $0x58] sm:$0xff] }
 0x154   :  { %v530_v25 = vmax.f32 %v1081_v24, 0.0  ;;  %v394_v26 = vpop.f32.mrb[47].mxu0  ;;  %v722_v24 = vld [vmem:[%s1637_s3 + $0x60] sm:$0xff] }
 0x155   :  { %v529_v27 = vmax.f32 %v394_v26, 0.0 }
 0x157   :  { %v1235_v28 = vpack.c.bf16 %v530_v25, %v529_v27  ;;  %v1084_v29 = vpop.f32.mrb[48].mxu0  ;;  %v723_v25 = vld [vmem:[%s1637_s3 + $0x68] sm:$0xff]  ;;  %v724_v27 = vld [vmem:[%s1637_s3 + $0x70] sm:$0xff] }
 0x158   :  { %v532_v30 = vmax.f32 %v1084_v29, 0.0  ;;  %v404_v32 = vpop.f32.mrb[49].mxu0  ;;  %v1256_v26 = vpack.c.bf16 %v723_v25, %v722_v24 }
 0x159   :  { %v531_v33 = vmax.f32 %v404_v32, 0.0 }
 0x15b   :  { %v1205_v34 = vpack.c.bf16 %v532_v30, %v531_v33  ;;  %v1087_v35 = vpop.f32.mrb[50].mxu0  ;;  %v1294_v30 = vmov 0.0  }
 0x15c   :  { %v534_v36 = vmax.f32 %v1087_v35, 0.0  ;;  %v414_v38 = vpop.f32.mrb[51].mxu0 }
 0x15d   :  { %v533_v39 = vmax.f32 %v414_v38, 0.0  ;;  %1206 = vmatprep.subr.bf16.mxu1 %v1205_v34 }
 0x15e   :  { %1208 = vmatpush3.bf16.msra.mxu1 %v1207_v58 }
 0x15f   :  { %v1209_v40 = vpack.c.bf16 %v534_v36, %v533_v39  ;;  %v1090_v41 = vpop.f32.mrb[52].mxu0 }
 0x160   :  { %v536_v42 = vmax.f32 %v1090_v41, 0.0  ;;  %v424_v43 = vpop.f32.mrb[53].mxu0 }
 0x161   :  { %v535_v44 = vmax.f32 %v424_v43, 0.0  ;;  %1210 = vmatprep.subr.bf16.mxu1 %v1209_v40 }
 0x162   :  { %1212 = vmatpush3.bf16.msra.mxu1 %v1211_v63 }
 0x163   :  { %v1213_v45 = vpack.c.bf16 %v536_v42, %v535_v44  ;;  %v1093_v46 = vpop.f32.mrb[54].mxu0 }
 0x164   :  { %v538_v47 = vmax.f32 %v1093_v46, 0.0  ;;  %v434_v48 = vpop.f32.mrb[55].mxu0 }
 0x165   :  { %v537_v49 = vmax.f32 %v434_v48, 0.0  ;;  %1214 = vmatprep.subr.bf16.mxu1 %v1213_v45 }
 0x166   :  { %1216 = vmatpush3.bf16.msra.mxu1 %v1215_v4 }
 0x167   :  { %v1217_v50 = vpack.c.bf16 %v538_v47, %v537_v49  ;;  %v1096_v51 = vpop.f32.mrb[56].mxu0 }
 0x168   :  { %v540_v52 = vmax.f32 %v1096_v51, 0.0  ;;  %v444_v53 = vpop.f32.mrb[57].mxu0 }
 0x169   :  { %v539_v54 = vmax.f32 %v444_v53, 0.0  ;;  %1218 = vmatprep.subr.bf16.mxu1 %v1217_v50 }
 0x16a   :  { %1220 = vmatpush3.bf16.msra.mxu1 %v1219_v9  ;;  %v712_v9 = vld [vmem:[%s1637_s3 + $0x10] sm:$0xff] }
 0x16b   :  { %v1221_v55 = vpack.c.bf16 %v540_v52, %v539_v54  ;;  %v1099_v56 = vpop.f32.mrb[58].mxu0 }
 0x16c   :  { %v542_v57 = vmax.f32 %v1099_v56, 0.0  ;;  %v454_v58 = vpop.f32.mrb[59].mxu0 }
 0x16d   :  { %v541_v59 = vmax.f32 %v454_v58, 0.0  ;;  %1222 = vmatprep.subr.bf16.mxu1 %v1221_v55 }
 0x16e   :  { %1224 = vmatpush3.bf16.msra.mxu1 %v1223_v14  ;;  %v715_v14 = vld [vmem:[%s1637_s3 + $0x28] sm:$0xff] }
 0x16f   :  { %v1225_v60 = vpack.c.bf16 %v542_v57, %v541_v59  ;;  %v1102_v61 = vpop.f32.mrb[60].mxu0  ;;  %v1244_v15 = vpack.c.bf16 %v715_v14, %v714_v13 }
 0x170   :  { %v544_v62 = vmax.f32 %v1102_v61, 0.0  ;;  %v464_v63 = vpop.f32.mrb[61].mxu0 }
 0x171   :  { %v543_v0 = vmax.f32 %v464_v63, 0.0  ;;  %1226 = vmatprep.subr.bf16.mxu1 %v1225_v60 }
 0x172   :  { %1228 = vmatpush3.bf16.msra.mxu1 %v1227_v18  ;;  %v718_v18 = vld [vmem:[%s1637_s3 + $0x40] sm:$0xff] }
 0x173   :  { %v1229_v1 = vpack.c.bf16 %v544_v62, %v543_v0  ;;  %v1105_v2 = vpop.f32.mrb[62].mxu0  ;;  %v1250_v20 = vpack.c.bf16 %v719_v19, %v718_v18 }
 0x174   :  { %v546_v3 = vmax.f32 %v1105_v2, 0.0  ;;  %v474_v4 = vpop.f32.mrb[63].mxu0 }
 0x175   :  { %v545_v5 = vmax.f32 %v474_v4, 0.0  ;;  %1230 = vmatprep.subr.bf16.mxu1 %v1229_v1 }
 0x176   :  { %1232 = vmatpush3.bf16.msra.mxu1 %v1231_v23  ;;  %v1253_v23 = vpack.c.bf16 %v721_v22, %v720_v21 }
 0x177   :  { %v1233_v6 = vpack.c.bf16 %v546_v3, %v545_v5 }
 0x179   :  { %1234 = vmatprep.subr.bf16.mxu1 %v1233_v6 }
 0x17a   :  { %1236 = vmatpush3.bf16.msra.mxu1 %v1235_v28  ;;  %v725_v28 = vld [vmem:[%s1637_s3 + $0x78] sm:$0xff]  ;;  %s1267_s3 = scalar_lea.vmem %s804_s18, 32 }
 0x17b   :  { %1237 = vmatprep.subr.bf16.mxu1 %v1292_v10  ;;  %v1259_v29 = vpack.c.bf16 %v725_v28, %v724_v27  ;;  %p1268_p0 = scmp.ne.s32.totalorder %s804_s18, %s1267_s3  ;;  %p1273_p2 = scmp.lt.s32.totalorder %s1267_s3, %s1267_s3 }
 0x17d   :  { %705 = vmatmul.mubr.f32.vlgmr.msra.gmra.mrb[2].mxu1 %v1568_v37  ;;  %v1241_v37 = vpack.c.bf16 %v713_v12, %v712_v9  ;;  %p1274_p3 = por %p1273_p2, %p1272_p1 }
 0x17e   :  { %1239 = vmatpush3.bf16.msra.mxu1 %v1238_v11  ;;  %1138 = vmatprep.mubr.msk.f32.mxu1 %vm1293_vm0, %v1294_v30 }
 0x17f   :  { %1240 = vmatprep.subr.bf16.mxu1 %v1292_v10  ;;  %p1275_p4 = pnand %p1274_p3, %p1268_p0 }
 0x182   :  { %1242 = vmatpush3.bf16.msra.mxu1 %v1241_v37 }
 0x183   :  { %1243 = vmatprep.subr.bf16.mxu1 %v1292_v10 }
 0x186   :  { %1245 = vmatpush3.bf16.msra.mxu1 %v1244_v15 }
 0x187   :  { %1246 = vmatprep.subr.bf16.mxu1 %v1292_v10 }
 0x18a   :  { %1248 = vmatpush3.bf16.msra.mxu1 %v1247_v17 }
 0x18b   :  { %1249 = vmatprep.subr.bf16.mxu1 %v1292_v10 }
 0x18e   :  { %1251 = vmatpush3.bf16.msra.mxu1 %v1250_v20 }
 0x18f   :  { %1252 = vmatprep.subr.bf16.mxu1 %v1292_v10 }
 0x192   :  { %1254 = vmatpush3.bf16.msra.mxu1 %v1253_v23 }
 0x193   :  { %1255 = vmatprep.subr.bf16.mxu1 %v1292_v10 }
 0x196   :  { %1257 = vmatpush3.bf16.msra.mxu1 %v1256_v26 }
 0x197   :  { %1258 = vmatprep.subr.bf16.mxu1 %v1292_v10 }
 0x19a   :  { %1260 = vmatpush3.bf16.msra.mxu1 %v1259_v29 }
 0x210   :  { %v923_v32 = vpop.f32.mrb[0].mxu1 }
 0x211   :  { %v924_v33 = vpop.f32.mrb[1].mxu1 }
 0x212   :  { %v925_v34 = vadd.f32 %v924_v33, %v923_v32 }
 0x250   :  { %v958_v35 = vpop.f32.mrb[2].mxu1 }
 0x251   :  { %v959_v36 = vpop.f32.mrb[3].mxu1 }
 0x252   :  { %v960_v38 = vadd.f32 %v959_v36, %v958_v35 }
 0x254   :  { %v707_v39 = vadd.f32 %v960_v38, %v925_v34 }
 0x256   :  { %1139 = vmatmul.mubr.f32.vlgmr.msra.gmra.mrb[4].mxu1 %v707_v39 }
 0x329   :  { %v792_v40 = vpop.f32.mrb[4].mxu1 }
 0x32a   :  { %796 = vst [vmem:[#allocation2] sm:$0x3] %v792_v40  ;;  %v1140_v41 = vpop.f32.mrb[5].mxu1 }
 0x32b   :  { %1278 = shalt.err (!%p1275_p4)
}
 0x32c   :  { %s1279_s21 = scalar_lea.hbm %s1638_s4, 32 }
 0x32d   :  { %p1280_p5 = scmp.ne.s32.totalorder %s1638_s4, %s1279_s21  ;;  %p1283_p6 = scmp.lt.u32.totalorder %s1279_s21, %s1638_s4 }
 0x32f   :  { %p1285_p7 = pnand %p1283_p6, %p1280_p5 }
 0x331   :  { %1288 = shalt.err (!%p1285_p7)
}
 0x332   :  { %806 = dma.vmem_to_hbm [thread:$0]  %s804_s18, 32, %s1638_s4, [#allocation3]  }
 0x333   :  { %1289 = dma.done.wait [#allocation3], 32  }
 0x334   :  { %1290 = vsyncadd [#allocation3], 4294967264 }
 0x335   :  { %810 = vsyncpa [#allocation3], 1 }

</bundles_post_ra>
